<compile_context>
chip_gen: v7x
topology: tpu7x:2x2x1
jax: 0.10.0
libtpu: 0.0.40
codegen_flags: <defaults>
</compile_context>

<pallas_src>
import functools
import math

import jax
import jax.numpy as jnp
import numpy as np
from jax.experimental import pallas as pl
from jax.experimental.pallas import tpu as pltpu

ALPHA_SP, GAMMA_SP = 1.0, 0.5
ALPHA_LP, GAMMA_LP = 1.0, 1.0


# ----------------------------------------------------------------------------
# Bicubic (align_corners=False, A=-0.75) interpolation weight matrix, matching
# PyTorch's upsample_bicubic2d coefficient computation.
# ----------------------------------------------------------------------------
def _bicubic_weight_matrix(in_size: int, out_size: int, a: float = -0.75) -> np.ndarray:
    def cc1(x):  # |t| <= 1
        return ((a + 2.0) * x - (a + 3.0)) * x * x + 1.0

    def cc2(x):  # 1 < |t| < 2
        return ((a * x - 5.0 * a) * x + 8.0 * a) * x - 4.0 * a

    scale = in_size / out_size
    w = np.zeros((out_size, in_size), dtype=np.float64)
    for i in range(out_size):
        src = scale * (i + 0.5) - 0.5
        f = math.floor(src)
        t = src - f
        coeffs = (cc2(t + 1.0), cc1(t), cc1(1.0 - t), cc2(2.0 - t))
        for k in range(4):
            idx = min(max(f - 1 + k, 0), in_size - 1)
            w[i, idx] += coeffs[k]
    return w.astype(np.float32)


def _default_vmem_limit_bytes() -> int:
    phys = 64 * 1024 * 1024
    try:
        info = pltpu.get_tpu_info()
        phys = int(getattr(info, "vmem_capacity_bytes", phys)) or phys
    except Exception:
        pass
    # ~96 MiB on 128-MiB parts (v5e/v6e), ~48 MiB on 64-MiB parts (v7x).
    return min(phys * 3 // 4, 100 * 1024 * 1024)


# ----------------------------------------------------------------------------
# Pallas kernel: grid = (phase, tile). phase 0 = global min/max, phase 1 = sum.
# ----------------------------------------------------------------------------
def _focal_kernel(lr_ref, hr_ref, x_ref, wh_ref, wwt_ref, o_ref,
                  sp_min_ref, sp_max_ref, lp_min_ref, lp_max_ref,
                  acc_ref, inv_sp_ref, inv_lp_ref, off_ref, whb_ref,
                  *, inv_n_total):
    phase = pl.program_id(0)
    step = pl.program_id(1)
    last_step = pl.num_programs(1) - 1

    tnc, h_in, w_in = lr_ref.shape
    _, h_out, w_out = hr_ref.shape

    # One-time setup at the very first grid step: broadcast the row-weight
    # matrix into persistent VMEM scratch and init the per-lane min/max.
    @pl.when((phase == 0) & (step == 0))
    def _prep():
        whb_ref[...] = jnp.broadcast_to(wh_ref[...], whb_ref.shape)
        sp_min_ref[...] = jnp.full(sp_min_ref.shape, jnp.inf, jnp.float32)
        lp_min_ref[...] = jnp.full(lp_min_ref.shape, jnp.inf, jnp.float32)
        sp_max_ref[...] = jnp.full(sp_max_ref.shape, -jnp.inf, jnp.float32)
        lp_max_ref[...] = jnp.full(lp_max_ref.shape, -jnp.inf, jnp.float32)

    # --- bicubic upsample of this tile (two MXU matmuls), fused into diff ----
    lr2 = lr_ref[...].reshape(tnc * h_in, w_in)                           # big-M matmul
    t = jnp.dot(lr2, wwt_ref[...], preferred_element_type=jnp.float32)    # (tnc*h_in, W)
    t3 = t.reshape(tnc, h_in, w_out)
    f = jnp.einsum('bij,bjk->bik', whb_ref[...], t3,
                   preferred_element_type=jnp.float32)                    # (tnc, H, W)

    diff = hr_ref[...] - f                 # y_hat = hr - f_BI_x
    y_sp = jnp.abs(diff)
    y_lp = jnp.abs(diff - x_ref[...])      # |hr - f_BI_x - x| == |x - y_hat|

    rows = tnc * h_out
    ys2 = y_sp.reshape(rows, w_out)
    yl2 = y_lp.reshape(rows, w_out)

    # --------------------- phase 0: per-lane running min/max -----------------
    @pl.when(phase == 0)
    def _stats():
        sp_min_ref[...] = jnp.minimum(sp_min_ref[...],
                                      jnp.min(ys2, axis=0, keepdims=True))
        sp_max_ref[...] = jnp.maximum(sp_max_ref[...],
                                      jnp.max(ys2, axis=0, keepdims=True))
        lp_min_ref[...] = jnp.minimum(lp_min_ref[...],
                                      jnp.min(yl2, axis=0, keepdims=True))
        lp_max_ref[...] = jnp.maximum(lp_max_ref[...],
                                      jnp.max(yl2, axis=0, keepdims=True))

    # ------------------- phase 1: fused-weight L1 accumulation ---------------
    @pl.when(phase == 1)
    def _accumulate():
        @pl.when(step == 0)
        def _init():
            sp_min = jnp.min(sp_min_ref[...])
            sp_max = jnp.max(sp_max_ref[...])
            lp_min = jnp.min(lp_min_ref[...])
            lp_max = jnp.max(lp_max_ref[...])
            # NOTE: like the PyTorch reference, NaN if max == min.
            inv_sp = 1.0 / (sp_max - sp_min)
            inv_lp = 1.0 / (lp_max - lp_min)
            inv_sp_ref[...] = jnp.reshape(inv_sp, (1, 1))
            inv_lp_ref[...] = jnp.reshape(inv_lp, (1, 1))
            # Min-offsets folded into ONE scalar subtract inside the exp (keeps
            # the exponent in [0, 2], so no overflow — unlike folding exp(-off)
            # into the final scale).
            off_ref[...] = jnp.reshape(sp_min * inv_sp + lp_min * inv_lp, (1, 1))
            acc_ref[...] = jnp.zeros(acc_ref.shape, jnp.float32)

        a = inv_sp_ref[...]    # (1, 1), broadcasts against (rows, W)
        b = inv_lp_ref[...]
        c0 = off_ref[...]
        # alpha_sp == alpha_lp == 1  =>  w_sp * w_lp = g_sp*g_lp * exp(.+.):
        # a single exp; gammas folded at finalize. |x - y_hat| == y_lp (reused).
        w = jnp.exp(ys2 * a + yl2 * b - c0)
        acc_ref[...] = acc_ref[...] + jnp.sum(w * yl2, axis=0, keepdims=True)

        @pl.when(step == last_step)
        def _finalize():
            total = jnp.sum(acc_ref[...])
            o_ref[...] = jnp.reshape(total, (1, 1)) * (GAMMA_SP * GAMMA_LP * inv_n_total)


# ----------------------------------------------------------------------------
# Wrapper
# ----------------------------------------------------------------------------
def focal_pixel_learning(x, hr, lr, *, tile_nc=None, input_budget_bytes=8 << 20):
    """x, hr: (N, C, H, W) float32; lr: (N, C, h, w) float32. Returns scalar loss."""
    n, c, h_out, w_out = hr.shape
    _, _, h_in, w_in = lr.shape
    assert x.shape == hr.shape and lr.shape[:2] == hr.shape[:2]
    nc = n * c

    wh = jnp.asarray(_bicubic_weight_matrix(h_in, h_out))       # (H, h)
    wwt = jnp.asarray(_bicubic_weight_matrix(w_in, w_out).T)    # (w, W)

    lr3 = lr.reshape(nc, h_in, w_in).astype(jnp.float32)
    hr3 = hr.reshape(nc, h_out, w_out).astype(jnp.float32)
    x3 = x.reshape(nc, h_out, w_out).astype(jnp.float32)
    # TODO(synk): optional bf16 streaming of hr/x/lr (~2x less HBM traffic on
    #             this mem-bound kernel) once the loss tolerance allows it.

    vmem_limit = _default_vmem_limit_bytes()
    vmem_budget = int(0.7 * vmem_limit)

    # Per-slab footprint of the streamed fp32 inputs (lr + hr + x).
    slab_bytes = 4 * (h_in * w_in + 2 * h_out * w_out)

    def tile_vmem_bytes(d):
        return (2 * d * slab_bytes                          # double-buffered inputs
                + 6 * d * h_out * w_out * 4                 # t, f, diff, y_sp, y_lp, w
                + d * h_out * h_in * 4                      # broadcast row weights
                + 2 * 4 * (h_out * h_in + h_in * w_out))    # weight matrices

    if tile_nc is None:
        tile_nc = 1
        for d in range(1, nc + 1):
            # Largest divisor under budget also maximizes the width-pass M dim
            # (tile_nc * h_in) toward the 256x256 MXU on v6e/v7x.
            if (nc % d == 0 and d * slab_bytes <= input_budget_bytes
                    and tile_vmem_bytes(d) <= vmem_budget):
                tile_nc = d
        # Whole problem resident in VMEM: with a single tile the block index is
        # identical across both phases, so inputs are DMA'd from HBM once
        # instead of twice (halves HBM traffic for small/medium problems).
        if tile_vmem_bytes(nc) <= vmem_budget:
            tile_nc = nc
    assert nc % tile_nc == 0, "tile_nc must divide N*C"
    # TODO(synk): masked last tile for N*C values with no good divisor.
    num_tiles = nc // tile_nc

    kernel = functools.partial(
        _focal_kernel, inv_n_total=1.0 / float(nc * h_out * w_out))

    def tile_map(p, i):
        # Serpentine across the phase boundary: phase 1 walks tiles in reverse,
        # so the tile resident at the end of phase 0 is reused without re-DMA.
        return (i + p * (num_tiles - 1 - 2 * i), 0, 0)

    grid = (2, num_tiles)   # (phase, tile); phase 0 fully, then phase 1.
    out = pl.pallas_call(
        kernel,
        out_shape=jax.ShapeDtypeStruct((1, 1), jnp.float32),
        grid_spec=pltpu.PrefetchScalarGridSpec(
            num_scalar_prefetch=0,
            grid=grid,
            in_specs=[
                pl.BlockSpec((tile_nc, h_in, w_in), tile_map),
                pl.BlockSpec((tile_nc, h_out, w_out), tile_map),
                pl.BlockSpec((tile_nc, h_out, w_out), tile_map),
                pl.BlockSpec((h_out, h_in), lambda p, i: (0, 0)),   # wh (2-D, small)
                pl.BlockSpec((w_in, w_out), lambda p, i: (0, 0)),   # wwt
            ],
            out_specs=pl.BlockSpec((1, 1), lambda p, i: (0, 0)),
            scratch_shapes=[
                pltpu.VMEM((1, w_out), jnp.float32),   # sp running min (per lane)
                pltpu.VMEM((1, w_out), jnp.float32),   # sp running max
                pltpu.VMEM((1, w_out), jnp.float32),   # lp running min
                pltpu.VMEM((1, w_out), jnp.float32),   # lp running max
                pltpu.VMEM((1, w_out), jnp.float32),   # per-lane partial weighted sum
                pltpu.VMEM((1, 1), jnp.float32),       # 1 / (sp_max - sp_min)
                pltpu.VMEM((1, 1), jnp.float32),       # 1 / (lp_max - lp_min)
                pltpu.VMEM((1, 1), jnp.float32),       # exp offset
                pltpu.VMEM((tile_nc, h_out, h_in), jnp.float32),  # broadcast wh
            ],
        ),
        compiler_params=pltpu.CompilerParams(
            # Tile axis carries min/max/acc scratch -> must stay sequential.
            # TODO(synk): v7x 2-TC split via per-tile partial outputs + a
            #             "parallel" tile axis (two pallas_calls).
            dimension_semantics=("arbitrary", "arbitrary"),
            vmem_limit_bytes=vmem_limit,
        ),
    )(lr3, hr3, x3, wh, wwt)
    return out[0, 0]


# Pure-JAX reference (same separable bicubic weights) for a sanity check.
def _reference(x, hr, lr):
    n, c, h_out, w_out = hr.shape
    _, _, h_in, w_in = lr.shape
    wh = jnp.asarray(_bicubic_weight_matrix(h_in, h_out))
    ww = jnp.asarray(_bicubic_weight_matrix(w_in, w_out))
    f_bi = jnp.einsum('ih,nchw,jw->ncij', wh, lr, ww)
    y_sp = jnp.abs(hr - f_bi)
    w_sp = jnp.exp((y_sp - y_sp.min()) / (y_sp.max() - y_sp.min()) * ALPHA_SP) * GAMMA_SP
    y_lp = jnp.abs(hr - f_bi - x)
    w_lp = jnp.exp((y_lp - y_lp.min()) / (y_lp.max() - y_lp.min()) * ALPHA_LP) * GAMMA_LP
    y_hat = hr - f_bi
    return jnp.mean(w_sp * w_lp * jnp.abs(x - y_hat))


if __name__ == "__main__":
    key = jax.random.PRNGKey(0)
    k1, k2, k3 = jax.random.split(key, 3)
    N, C, H, W = 2, 3, 16, 16
    h, w = H // 2, W // 2
    x = jax.random.normal(k1, (N, C, H, W), dtype=jnp.float32)
    hr = jax.random.normal(k2, (N, C, H, W), dtype=jnp.float32)
    lr = jax.random.normal(k3, (N, C, h, w), dtype=jnp.float32)

    ref = jax.block_until_ready(_reference(x, hr, lr))

    # Multi-tile grid: exercises two-pass min/max, serpentine re-streaming and
    # cross-tile accumulation.
    loss_tiled = jax.block_until_ready(focal_pixel_learning(x, hr, lr, tile_nc=2))
    # Auto tile selection (whole problem fits -> single tile, inputs read once).
    loss_auto = jax.block_until_ready(focal_pixel_learning(x, hr, lr))

    for val in (loss_tiled, loss_auto):
        assert jnp.isfinite(val), "non-finite loss"
        assert abs(float(val) - float(ref)) < 1e-3, (float(val), float(ref))
    print("KERNEL_OK")
</pallas_src>

<mosaic_0001>
module attributes {stable_mosaic.version = 11 : i64} {
  func.func @_focal_kernel(%arg0: i32, %arg1: i32, %arg2: memref<2x8x8xf32, #tpu.memory_space<vmem>>, %arg3: memref<2x16x16xf32, #tpu.memory_space<vmem>>, %arg4: memref<2x16x16xf32, #tpu.memory_space<vmem>>, %arg5: memref<16x8xf32, #tpu.memory_space<vmem>>, %arg6: memref<8x16xf32, #tpu.memory_space<vmem>>, %arg7: memref<1x1xf32, #tpu.memory_space<vmem>>, %arg8: memref<1x16xf32, #tpu.memory_space<vmem>>, %arg9: memref<1x16xf32, #tpu.memory_space<vmem>>, %arg10: memref<1x16xf32, #tpu.memory_space<vmem>>, %arg11: memref<1x16xf32, #tpu.memory_space<vmem>>, %arg12: memref<1x16xf32, #tpu.memory_space<vmem>>, %arg13: memref<1x1xf32, #tpu.memory_space<vmem>>, %arg14: memref<1x1xf32, #tpu.memory_space<vmem>>, %arg15: memref<1x1xf32, #tpu.memory_space<vmem>>, %arg16: memref<2x16x8xf32, #tpu.memory_space<vmem>>) attributes {dimension_semantics = [#tpu.dimension_semantics<arbitrary>, #tpu.dimension_semantics<arbitrary>], iteration_bounds = array<i64: 2, 3>, scalar_prefetch = 0 : i64, scratch_operands = 9 : i64, tpu.core_type = #tpu.core_type<tc>, window_params = [{transform_indices = @transform_0, window_bounds = array<i64: 2, 8, 8>}, {transform_indices = @transform_1, window_bounds = array<i64: 2, 16, 16>}, {transform_indices = @transform_2, window_bounds = array<i64: 2, 16, 16>}, {pipeline_mode = #tpu.pipeline_mode<synchronous>, transform_indices = @transform_3, window_bounds = array<i64: 16, 8>}, {pipeline_mode = #tpu.pipeline_mode<synchronous>, transform_indices = @transform_4, window_bounds = array<i64: 8, 16>}, {pipeline_mode = #tpu.pipeline_mode<synchronous>, transform_indices = @transform_5, window_bounds = array<i64: 1, 1>}]} {
    %c0_i32 = arith.constant 0 : i32
    %0 = arith.cmpi eq, %arg0, %c0_i32 : i32
    %c0_i32_0 = arith.constant 0 : i32
    %1 = arith.cmpi eq, %arg1, %c0_i32_0 : i32
    %2 = arith.andi %0, %1 : i1
    %3 = arith.extui %2 : i1 to i32
    %c0_i32_1 = arith.constant 0 : i32
    %4 = arith.cmpi ne, %3, %c0_i32_1 : i32
    scf.if %4 {
      %c0_19 = arith.constant 0 : index
      %c0_20 = arith.constant 0 : index
      %26 = vector.load %arg5[%c0_19, %c0_20] : memref<16x8xf32, #tpu.memory_space<vmem>>, vector<16x8xf32>
      %27 = vector.shape_cast %26 : vector<16x8xf32> to vector<1x16x8xf32>
      %28 = vector.broadcast %27 : vector<1x16x8xf32> to vector<2x16x8xf32>
      %c0_21 = arith.constant 0 : index
      %c0_22 = arith.constant 0 : index
      %c0_23 = arith.constant 0 : index
      %29 = vector.load %arg16[%c0_21, %c0_22, %c0_23] : memref<2x16x8xf32, #tpu.memory_space<vmem>>, vector<2x16x8xf32>
      tpu.vector_store %arg16[%c0_21, %c0_22, %c0_23], %28 {strides = array<i32>} : memref<2x16x8xf32, #tpu.memory_space<vmem>>, vector<2x16x8xf32>,
      %cst_24 = arith.constant 0x7F800000 : f32
      %30 = vector.broadcast %cst_24 : f32 to vector<1x16xf32>
      %c0_25 = arith.constant 0 : index
      %c0_26 = arith.constant 0 : index
      %31 = vector.load %arg8[%c0_25, %c0_26] : memref<1x16xf32, #tpu.memory_space<vmem>>, vector<1x16xf32>
      tpu.vector_store %arg8[%c0_25, %c0_26], %30 {strides = array<i32>} : memref<1x16xf32, #tpu.memory_space<vmem>>, vector<1x16xf32>,
      %cst_27 = arith.constant 0x7F800000 : f32
      %32 = vector.broadcast %cst_27 : f32 to vector<1x16xf32>
      %c0_28 = arith.constant 0 : index
      %c0_29 = arith.constant 0 : index
      %33 = vector.load %arg10[%c0_28, %c0_29] : memref<1x16xf32, #tpu.memory_space<vmem>>, vector<1x16xf32>
      tpu.vector_store %arg10[%c0_28, %c0_29], %32 {strides = array<i32>} : memref<1x16xf32, #tpu.memory_space<vmem>>, vector<1x16xf32>,
      %cst_30 = arith.constant 0xFF800000 : f32
      %34 = vector.broadcast %cst_30 : f32 to vector<1x16xf32>
      %c0_31 = arith.constant 0 : index
      %c0_32 = arith.constant 0 : index
      %35 = vector.load %arg9[%c0_31, %c0_32] : memref<1x16xf32, #tpu.memory_space<vmem>>, vector<1x16xf32>
      tpu.vector_store %arg9[%c0_31, %c0_32], %34 {strides = array<i32>} : memref<1x16xf32, #tpu.memory_space<vmem>>, vector<1x16xf32>,
      %cst_33 = arith.constant 0xFF800000 : f32
      %36 = vector.broadcast %cst_33 : f32 to vector<1x16xf32>
      %c0_34 = arith.constant 0 : index
      %c0_35 = arith.constant 0 : index
      %37 = vector.load %arg11[%c0_34, %c0_35] : memref<1x16xf32, #tpu.memory_space<vmem>>, vector<1x16xf32>
      tpu.vector_store %arg11[%c0_34, %c0_35], %36 {strides = array<i32>} : memref<1x16xf32, #tpu.memory_space<vmem>>, vector<1x16xf32>,
    } else {
    }
    %c0 = arith.constant 0 : index
    %c0_2 = arith.constant 0 : index
    %c0_3 = arith.constant 0 : index
    %5 = vector.load %arg2[%c0, %c0_2, %c0_3] : memref<2x8x8xf32, #tpu.memory_space<vmem>>, vector<2x8x8xf32>
    %6 = vector.shape_cast %5 : vector<2x8x8xf32> to vector<16x8xf32>
    %c0_4 = arith.constant 0 : index
    %c0_5 = arith.constant 0 : index
    %7 = vector.load %arg6[%c0_4, %c0_5] : memref<8x16xf32, #tpu.memory_space<vmem>>, vector<8x16xf32>
    %cst = arith.constant dense<0.000000e+00> : vector<16x16xf32>
    %8 = tpu.matmul %6, %7, %cst {dimension_numbers = #tpu.dot_dimension_numbers<[1], [0], [0], [1], [0, 0, 1, 1], [], []>} : vector<16x8xf32>, vector<8x16xf32>, vector<16x16xf32> -> vector<16x16xf32>
    %9 = vector.shape_cast %8 : vector<16x16xf32> to vector<2x8x16xf32>
    %c0_6 = arith.constant 0 : index
    %c0_7 = arith.constant 0 : index
    %c0_8 = arith.constant 0 : index
    %10 = vector.load %arg16[%c0_6, %c0_7, %c0_8] : memref<2x16x8xf32, #tpu.memory_space<vmem>>, vector<2x16x8xf32>
    "tpu.trace_start"() <{level = 10 : i32, message = "bij,bjk->bik"}> : () -> ()
    %cst_9 = arith.constant dense<0.000000e+00> : vector<2x16x16xf32>
    %11 = tpu.matmul %10, %9, %cst_9 {dimension_numbers = #tpu.dot_dimension_numbers<[2], [1], [1], [2], [0, 0, 0, 1, 1, 2], [0], [0]>} : vector<2x16x8xf32>, vector<2x8x16xf32>, vector<2x16x16xf32> -> vector<2x16x16xf32>
    "tpu.trace_stop"() : () -> ()
    %c0_10 = arith.constant 0 : index
    %c0_11 = arith.constant 0 : index
    %c0_12 = arith.constant 0 : index
    %12 = vector.load %arg3[%c0_10, %c0_11, %c0_12] : memref<2x16x16xf32, #tpu.memory_space<vmem>>, vector<2x16x16xf32>
    %13 = arith.subf %12, %11 : vector<2x16x16xf32>
    %14 = math.absf %13 : vector<2x16x16xf32>
    %c0_13 = arith.constant 0 : index
    %c0_14 = arith.constant 0 : index
    %c0_15 = arith.constant 0 : index
    %15 = vector.load %arg4[%c0_13, %c0_14, %c0_15] : memref<2x16x16xf32, #tpu.memory_space<vmem>>, vector<2x16x16xf32>
    %16 = arith.subf %13, %15 : vector<2x16x16xf32>
    %17 = math.absf %16 : vector<2x16x16xf32>
    %18 = vector.shape_cast %14 : vector<2x16x16xf32> to vector<32x16xf32>
    %19 = vector.shape_cast %17 : vector<2x16x16xf32> to vector<32x16xf32>
    %c0_i32_16 = arith.constant 0 : i32
    %20 = arith.cmpi eq, %arg0, %c0_i32_16 : i32
    %21 = arith.extui %20 : i1 to i32
    %c0_i32_17 = arith.constant 0 : i32
    %22 = arith.cmpi ne, %21, %c0_i32_17 : i32
    scf.if %22 {
      %c0_19 = arith.constant 0 : index
      %c0_20 = arith.constant 0 : index
      %26 = vector.load %arg8[%c0_19, %c0_20] : memref<1x16xf32, #tpu.memory_space<vmem>>, vector<1x16xf32>
      %cst_21 = arith.constant dense<0x7F800000> : vector<16xf32>
      %27 = vector.multi_reduction <minimumf>, %18, %cst_21 [0] : vector<32x16xf32> to vector<16xf32>
      %28 = vector.shape_cast %27 : vector<16xf32> to vector<1x16xf32>
      %29 = arith.minimumf %26, %28 : vector<1x16xf32>
      %c0_22 = arith.constant 0 : index
      %c0_23 = arith.constant 0 : index
      %30 = vector.load %arg8[%c0_22, %c0_23] : memref<1x16xf32, #tpu.memory_space<vmem>>, vector<1x16xf32>
      tpu.vector_store %arg8[%c0_22, %c0_23], %29 {strides = array<i32>} : memref<1x16xf32, #tpu.memory_space<vmem>>, vector<1x16xf32>,
      %c0_24 = arith.constant 0 : index
      %c0_25 = arith.constant 0 : index
      %31 = vector.load %arg9[%c0_24, %c0_25] : memref<1x16xf32, #tpu.memory_space<vmem>>, vector<1x16xf32>
      %cst_26 = arith.constant dense<0xFF800000> : vector<16xf32>
      %32 = vector.multi_reduction <maximumf>, %18, %cst_26 [0] : vector<32x16xf32> to vector<16xf32>
      %33 = vector.shape_cast %32 : vector<16xf32> to vector<1x16xf32>
      %34 = arith.maximumf %31, %33 : vector<1x16xf32>
      %c0_27 = arith.constant 0 : index
      %c0_28 = arith.constant 0 : index
      %35 = vector.load %arg9[%c0_27, %c0_28] : memref<1x16xf32, #tpu.memory_space<vmem>>, vector<1x16xf32>
      tpu.vector_store %arg9[%c0_27, %c0_28], %34 {strides = array<i32>} : memref<1x16xf32, #tpu.memory_space<vmem>>, vector<1x16xf32>,
      %c0_29 = arith.constant 0 : index
      %c0_30 = arith.constant 0 : index
      %36 = vector.load %arg10[%c0_29, %c0_30] : memref<1x16xf32, #tpu.memory_space<vmem>>, vector<1x16xf32>
      %cst_31 = arith.constant dense<0x7F800000> : vector<16xf32>
      %37 = vector.multi_reduction <minimumf>, %19, %cst_31 [0] : vector<32x16xf32> to vector<16xf32>
      %38 = vector.shape_cast %37 : vector<16xf32> to vector<1x16xf32>
      %39 = arith.minimumf %36, %38 : vector<1x16xf32>
      %c0_32 = arith.constant 0 : index
      %c0_33 = arith.constant 0 : index
      %40 = vector.load %arg10[%c0_32, %c0_33] : memref<1x16xf32, #tpu.memory_space<vmem>>, vector<1x16xf32>
      tpu.vector_store %arg10[%c0_32, %c0_33], %39 {strides = array<i32>} : memref<1x16xf32, #tpu.memory_space<vmem>>, vector<1x16xf32>,
      %c0_34 = arith.constant 0 : index
      %c0_35 = arith.constant 0 : index
      %41 = vector.load %arg11[%c0_34, %c0_35] : memref<1x16xf32, #tpu.memory_space<vmem>>, vector<1x16xf32>
      %cst_36 = arith.constant dense<0xFF800000> : vector<16xf32>
      %42 = vector.multi_reduction <maximumf>, %19, %cst_36 [0] : vector<32x16xf32> to vector<16xf32>
      %43 = vector.shape_cast %42 : vector<16xf32> to vector<1x16xf32>
      %44 = arith.maximumf %41, %43 : vector<1x16xf32>
      %c0_37 = arith.constant 0 : index
      %c0_38 = arith.constant 0 : index
      %45 = vector.load %arg11[%c0_37, %c0_38] : memref<1x16xf32, #tpu.memory_space<vmem>>, vector<1x16xf32>
      tpu.vector_store %arg11[%c0_37, %c0_38], %44 {strides = array<i32>} : memref<1x16xf32, #tpu.memory_space<vmem>>, vector<1x16xf32>,
    } else {
    }
    %c1_i32 = arith.constant 1 : i32
    %23 = arith.cmpi eq, %arg0, %c1_i32 : i32
    %24 = arith.extui %23 : i1 to i32
    %c0_i32_18 = arith.constant 0 : i32
    %25 = arith.cmpi ne, %24, %c0_i32_18 : i32
    scf.if %25 {
      %c0_i32_19 = arith.constant 0 : i32
      %26 = arith.cmpi eq, %arg1, %c0_i32_19 : i32
      %27 = arith.extui %26 : i1 to i32
      %c0_i32_20 = arith.constant 0 : i32
      %28 = arith.cmpi ne, %27, %c0_i32_20 : i32
      scf.if %28 {
        %c0_33 = arith.constant 0 : index
        %c0_34 = arith.constant 0 : index
        %49 = vector.load %arg8[%c0_33, %c0_34] : memref<1x16xf32, #tpu.memory_space<vmem>>, vector<1x16xf32>
        %50 = vector.shape_cast %49 : vector<1x16xf32> to vector<1x1x16xf32>
        %cst_35 = arith.constant dense<0x7F800000> : vector<1xf32>
        %51 = vector.multi_reduction <minimumf>, %50, %cst_35 [1, 2] : vector<1x1x16xf32> to vector<1xf32>
        %52 = vector.shape_cast %51 : vector<1xf32> to vector<1x1x1xf32>
        %53 = vector.extract %52[0, 0, 0] : f32 from vector<1x1x1xf32>
        %c0_36 = arith.constant 0 : index
        %c0_37 = arith.constant 0 : index
        %54 = vector.load %arg9[%c0_36, %c0_37] : memref<1x16xf32, #tpu.memory_space<vmem>>, vector<1x16xf32>
        %55 = vector.shape_cast %54 : vector<1x16xf32> to vector<1x1x16xf32>
        %cst_38 = arith.constant dense<0xFF800000> : vector<1xf32>
        %56 = vector.multi_reduction <maximumf>, %55, %cst_38 [1, 2] : vector<1x1x16xf32> to vector<1xf32>
        %57 = vector.shape_cast %56 : vector<1xf32> to vector<1x1x1xf32>
        %58 = vector.extract %57[0, 0, 0] : f32 from vector<1x1x1xf32>
        %c0_39 = arith.constant 0 : index
        %c0_40 = arith.constant 0 : index
        %59 = vector.load %arg10[%c0_39, %c0_40] : memref<1x16xf32, #tpu.memory_space<vmem>>, vector<1x16xf32>
        %60 = vector.shape_cast %59 : vector<1x16xf32> to vector<1x1x16xf32>
        %cst_41 = arith.constant dense<0x7F800000> : vector<1xf32>
        %61 = vector.multi_reduction <minimumf>, %60, %cst_41 [1, 2] : vector<1x1x16xf32> to vector<1xf32>
        %62 = vector.shape_cast %61 : vector<1xf32> to vector<1x1x1xf32>
        %63 = vector.extract %62[0, 0, 0] : f32 from vector<1x1x1xf32>
        %c0_42 = arith.constant 0 : index
        %c0_43 = arith.constant 0 : index
        %64 = vector.load %arg11[%c0_42, %c0_43] : memref<1x16xf32, #tpu.memory_space<vmem>>, vector<1x16xf32>
        %65 = vector.shape_cast %64 : vector<1x16xf32> to vector<1x1x16xf32>
        %cst_44 = arith.constant dense<0xFF800000> : vector<1xf32>
        %66 = vector.multi_reduction <maximumf>, %65, %cst_44 [1, 2] : vector<1x1x16xf32> to vector<1xf32>
        %67 = vector.shape_cast %66 : vector<1xf32> to vector<1x1x1xf32>
        %68 = vector.extract %67[0, 0, 0] : f32 from vector<1x1x1xf32>
        %69 = arith.subf %58, %53 : f32
        %cst_45 = arith.constant 1.000000e+00 : f32
        %70 = arith.divf %cst_45, %69 : f32
        %71 = arith.subf %68, %63 : f32
        %cst_46 = arith.constant 1.000000e+00 : f32
        %72 = arith.divf %cst_46, %71 : f32
        %73 = vector.broadcast %70 : f32 to vector<1x1xf32>
        %c0_47 = arith.constant 0 : index
        %c0_48 = arith.constant 0 : index
        %74 = vector.load %arg13[%c0_47, %c0_48] : memref<1x1xf32, #tpu.memory_space<vmem>>, vector<1x1xf32>
        tpu.vector_store %arg13[%c0_47, %c0_48], %73 {strides = array<i32>} : memref<1x1xf32, #tpu.memory_space<vmem>>, vector<1x1xf32>,
        %75 = vector.broadcast %72 : f32 to vector<1x1xf32>
        %c0_49 = arith.constant 0 : index
        %c0_50 = arith.constant 0 : index
        %76 = vector.load %arg14[%c0_49, %c0_50] : memref<1x1xf32, #tpu.memory_space<vmem>>, vector<1x1xf32>
        tpu.vector_store %arg14[%c0_49, %c0_50], %75 {strides = array<i32>} : memref<1x1xf32, #tpu.memory_space<vmem>>, vector<1x1xf32>,
        %77 = arith.mulf %53, %70 : f32
        %78 = arith.mulf %63, %72 : f32
        %79 = arith.addf %77, %78 : f32
        %80 = vector.broadcast %79 : f32 to vector<1x1xf32>
        %c0_51 = arith.constant 0 : index
        %c0_52 = arith.constant 0 : index
        %81 = vector.load %arg15[%c0_51, %c0_52] : memref<1x1xf32, #tpu.memory_space<vmem>>, vector<1x1xf32>
        tpu.vector_store %arg15[%c0_51, %c0_52], %80 {strides = array<i32>} : memref<1x1xf32, #tpu.memory_space<vmem>>, vector<1x1xf32>,
        %cst_53 = arith.constant 0.000000e+00 : f32
        %82 = vector.broadcast %cst_53 : f32 to vector<1x16xf32>
        %c0_54 = arith.constant 0 : index
        %c0_55 = arith.constant 0 : index
        %83 = vector.load %arg12[%c0_54, %c0_55] : memref<1x16xf32, #tpu.memory_space<vmem>>, vector<1x16xf32>
        tpu.vector_store %arg12[%c0_54, %c0_55], %82 {strides = array<i32>} : memref<1x16xf32, #tpu.memory_space<vmem>>, vector<1x16xf32>,
      } else {
      }
      %c0_21 = arith.constant 0 : index
      %c0_22 = arith.constant 0 : index
      %29 = vector.load %arg13[%c0_21, %c0_22] : memref<1x1xf32, #tpu.memory_space<vmem>>, vector<1x1xf32>
      %c0_23 = arith.constant 0 : index
      %c0_24 = arith.constant 0 : index
      %30 = vector.load %arg14[%c0_23, %c0_24] : memref<1x1xf32, #tpu.memory_space<vmem>>, vector<1x1xf32>
      %c0_25 = arith.constant 0 : index
      %c0_26 = arith.constant 0 : index
      %31 = vector.load %arg15[%c0_25, %c0_26] : memref<1x1xf32, #tpu.memory_space<vmem>>, vector<1x1xf32>
      %32 = vector.broadcast %29 : vector<1x1xf32> to vector<32x16xf32>
      %33 = arith.mulf %18, %32 : vector<32x16xf32>
      %34 = vector.broadcast %30 : vector<1x1xf32> to vector<32x16xf32>
      %35 = arith.mulf %19, %34 : vector<32x16xf32>
      %36 = arith.addf %33, %35 : vector<32x16xf32>
      %37 = vector.broadcast %31 : vector<1x1xf32> to vector<32x16xf32>
      %38 = arith.subf %36, %37 : vector<32x16xf32>
      %39 = math.exp %38 : vector<32x16xf32>
      %c0_27 = arith.constant 0 : index
      %c0_28 = arith.constant 0 : index
      %40 = vector.load %arg12[%c0_27, %c0_28] : memref<1x16xf32, #tpu.memory_space<vmem>>, vector<1x16xf32>
      %41 = arith.mulf %39, %19 : vector<32x16xf32>
      %cst_29 = arith.constant dense<0.000000e+00> : vector<16xf32>
      %42 = vector.multi_reduction <add>, %41, %cst_29 [0] : vector<32x16xf32> to vector<16xf32>
      %43 = vector.shape_cast %42 : vector<16xf32> to vector<1x16xf32>
      %44 = arith.addf %40, %43 : vector<1x16xf32>
      %c0_30 = arith.constant 0 : index
      %c0_31 = arith.constant 0 : index
      %45 = vector.load %arg12[%c0_30, %c0_31] : memref<1x16xf32, #tpu.memory_space<vmem>>, vector<1x16xf32>
      tpu.vector_store %arg12[%c0_30, %c0_31], %44 {strides = array<i32>} : memref<1x16xf32, #tpu.memory_space<vmem>>, vector<1x16xf32>,
      %c2_i32 = arith.constant 2 : i32
      %46 = arith.cmpi eq, %arg1, %c2_i32 : i32
      %47 = arith.extui %46 : i1 to i32
      %c0_i32_32 = arith.constant 0 : i32
      %48 = arith.cmpi ne, %47, %c0_i32_32 : i32
      scf.if %48 {
        %c0_33 = arith.constant 0 : index
        %c0_34 = arith.constant 0 : index
        %49 = vector.load %arg12[%c0_33, %c0_34] : memref<1x16xf32, #tpu.memory_space<vmem>>, vector<1x16xf32>
        %50 = vector.shape_cast %49 : vector<1x16xf32> to vector<1x1x16xf32>
        %cst_35 = arith.constant dense<0.000000e+00> : vector<1xf32>
        %51 = vector.multi_reduction <add>, %50, %cst_35 [1, 2] : vector<1x1x16xf32> to vector<1xf32>
        %52 = vector.shape_cast %51 : vector<1xf32> to vector<1x1x1xf32>
        %53 = vector.extract %52[0, 0, 0] : f32 from vector<1x1x1xf32>
        %54 = vector.broadcast %53 : f32 to vector<1x1xf32>
        %cst_36 = arith.constant 3.25520843E-4 : f32
        %55 = vector.broadcast %cst_36 : f32 to vector<1x1xf32>
        %56 = arith.mulf %54, %55 : vector<1x1xf32>
        %c0_37 = arith.constant 0 : index
        %c0_38 = arith.constant 0 : index
        %57 = vector.load %arg7[%c0_37, %c0_38] : memref<1x1xf32, #tpu.memory_space<vmem>>, vector<1x1xf32>
        tpu.vector_store %arg7[%c0_37, %c0_38], %56 {strides = array<i32>} : memref<1x1xf32, #tpu.memory_space<vmem>>, vector<1x1xf32>,
      } else {
      }
    } else {
    }
    return
  }
  func.func @transform_0(%arg0: i32, %arg1: i32) -> (i32, i32, i32) {
    %c2_i32 = arith.constant 2 : i32
    %0 = arith.muli %c2_i32, %arg1 : i32
    %c2_i32_0 = arith.constant 2 : i32
    %1 = arith.subi %c2_i32_0, %0 : i32
    %2 = arith.muli %arg0, %1 : i32
    %3 = arith.addi %arg1, %2 : i32
    %c0_i32 = arith.constant 0 : i32
    %c0_i32_1 = arith.constant 0 : i32
    %c0_i32_2 = arith.constant 0 : i32
    return %3, %c0_i32, %c0_i32_1 : i32, i32, i32
  }
  func.func @transform_1(%arg0: i32, %arg1: i32) -> (i32, i32, i32) {
    %c2_i32 = arith.constant 2 : i32
    %0 = arith.muli %c2_i32, %arg1 : i32
    %c2_i32_0 = arith.constant 2 : i32
    %1 = arith.subi %c2_i32_0, %0 : i32
    %2 = arith.muli %arg0, %1 : i32
    %3 = arith.addi %arg1, %2 : i32
    %c0_i32 = arith.constant 0 : i32
    %c0_i32_1 = arith.constant 0 : i32
    %c0_i32_2 = arith.constant 0 : i32
    return %3, %c0_i32, %c0_i32_1 : i32, i32, i32
  }
  func.func @transform_2(%arg0: i32, %arg1: i32) -> (i32, i32, i32) {
    %c2_i32 = arith.constant 2 : i32
    %0 = arith.muli %c2_i32, %arg1 : i32
    %c2_i32_0 = arith.constant 2 : i32
    %1 = arith.subi %c2_i32_0, %0 : i32
    %2 = arith.muli %arg0, %1 : i32
    %3 = arith.addi %arg1, %2 : i32
    %c0_i32 = arith.constant 0 : i32
    %c0_i32_1 = arith.constant 0 : i32
    %c0_i32_2 = arith.constant 0 : i32
    return %3, %c0_i32, %c0_i32_1 : i32, i32, i32
  }
  func.func @transform_3(%arg0: i32, %arg1: i32) -> (i32, i32) {
    %c0_i32 = arith.constant 0 : i32
    %c0_i32_0 = arith.constant 0 : i32
    %c0_i32_1 = arith.constant 0 : i32
    return %c0_i32, %c0_i32_0 : i32, i32
  }
  func.func @transform_4(%arg0: i32, %arg1: i32) -> (i32, i32) {
    %c0_i32 = arith.constant 0 : i32
    %c0_i32_0 = arith.constant 0 : i32
    %c0_i32_1 = arith.constant 0 : i32
    return %c0_i32, %c0_i32_0 : i32, i32
  }
  func.func @transform_5(%arg0: i32, %arg1: i32) -> (i32, i32) {
    %c0_i32 = arith.constant 0 : i32
    %c0_i32_0 = arith.constant 0 : i32
    %c0_i32_1 = arith.constant 0 : i32
    return %c0_i32, %c0_i32_0 : i32, i32
  }
}

</mosaic_0001>

<bundles_post_ra>
// kernel: tpu_custom_call.1
= control target key start
LH: loop header
LB: loop body
LE: loop exit
PB: predicated region body
PF: predicated region fallthrough
CT: control target
= control target key end

     0   :  { %s1809_s0 = inlined_call_operand.hbm [shape: f32[6,8,8], index: 0, kind: input, shape index: {}]   ;;  %s1810_s1 = inlined_call_operand.hbm [shape: f32[6,16,16], index: 1, kind: input, shape index: {}]   ;;  %s1811_s2 = inlined_call_operand.hbm [shape: f32[6,16,16], index: 2, kind: input, shape index: {}]   ;;  %s1812_s3 = inlined_call_operand.vmem [shape: f32[16,8], index: 3, kind: input, shape index: {}]   ;;  %s1813_s4 = inlined_call_operand.vmem [shape: f32[8,16], index: 4, kind: input, shape index: {}]   ;;  %s1814_s5 = inlined_call_operand.hbm [shape: f32[1,1], index: 5, kind: output, shape index: {}]  }
   0x1   :  { %1826 = sst [smem:[#allocation25_spill]] %s1810_s1 }
   0x2   :  { %10 = vsyncpa [#allocation12], 0 }
   0x3   :  { %12 = vsyncpa [#allocation12 + $0x1], 0 }
   0x4   :  { %13 = vsyncpa [#allocation15], 0 }
   0x5   :  { %15 = vsyncpa [#allocation15 + $0x1], 0 }
   0x6   :  { %16 = vsyncpa [#allocation13], 0  ;;  %s1443_s18 = smov 0   ;;  %s1445_s19 = smov 0  }
   0x7   :  { %s1447_s20 = smov 0   ;;  %s1449_s21 = smov 0  }
   0x8   :  { %s1451_s22 = smov 0   ;;  %s1453_s23 = smov 0  }
   0x9   :  { %s1455_s24 = smov 0   ;;  %s1457_s25 = smov 0  }
   0xa LB: > { %1827 = sst [smem:[#allocation21_spill]] %s1393_s23  ;;  %s1484_s26 = sadd.s32 4294967295, %s1401_s25   ;;  %s1401_s25 = sphi %s1457_s25, %s22_s25   ;;  %s1397_s24 = sphi %s1455_s24, %s1845_s24   ;;  %s1393_s23 = sphi %s1453_s23, %s1844_s23   ;;  %s1389_s22 = sphi %s1451_s22, %s1843_s22   ;;  %s1385_s21 = sphi %s1449_s21, %s1842_s21   ;;  %s1381_s20 = sphi %s1447_s20, %s1848_s20   ;;  %s1377_s19 = sphi %s1445_s19, %s1847_s19   ;;  %s1373_s18 = sphi %s1443_s18, %s1846_s18  }
   0xb   : > { %1828 = sst [smem:[#allocation22_spill]] %s1397_s24  ;;  %s31_s27 = sadd.s32 1, %s1393_s23 }
   0xc   : > { %p32_p0 = scmp.ge.s32.totalorder %s31_s27, 3  ;;  %s34_s28 = sadd.s32 1, %s1397_s24 }
   0xd   : > { %s1017_s29 = sshll.u32 %s1393_s23, 1  ;;  %s49_s30 = sadd.s32 1, %s1381_s20 }
   0xe   : > { %s1850_s27 = smov (%p32_p0, %s31_s27), 0  ;;  %s1852_s28 = smov (!%p32_p0, %s34_s28), %s1397_s24 }
   0xf   : > { %1829 = sst [smem:[#allocation23_spill]] %s1850_s27  ;;  %s39_s6 = ssub.s32 2, %s1017_s29 }
  0x10   : > { %s1018_s7 = sshll.u32 %s1850_s27, 1  ;;  %p36_p1 = scmp.ge.s32.totalorder %s1852_s28, 2 }
  0x11   : > { %s40_s8 = smul.u32 %s1397_s24, %s39_s6  ;;  %s43_s9 = ssub.s32 2, %s1018_s7 }
  0x12   : > { %p56_p2 = scmp.ne.s32.totalorder %s1381_s20, %s1377_s19  ;;  %s1854_s28 = smov (%p36_p1, %s1852_s28), 0 }
  0x13   : > { %1830 = sst [smem:[#allocation24_spill]] %s1854_s28  ;;  %s1500_s10 = sadd.s32 %s1393_s23, %s40_s8 }
  0x14   : > { %p57_p3 = scmp.eq.s32.totalorder %s1401_s25, 0  ;;  %s44_s11 = smul.u32 %s43_s9, %s1854_s28 }
  0x15   : > { %p62_p4 = scmp.ne.s32.totalorder %s1377_s19, %s1373_s18  ;;  %p63_p6 = scmp.eq.s32.totalorder %s1484_s26, 0 }
  0x16   : > { %p58_p5 = por %p57_p3, %p56_p2  ;;  %s45_s12 = sadd.s32 %s44_s11, %s1850_s27 }
  0x17   : > { %s46_s13 = ssub.s32 %s1500_s10, %s45_s12  ;;  %p1509_p7 = por %p63_p6, %p62_p4 }
  0x18   : > { %p47_p8 = scmp.eq.s32.totalorder %s46_s13, 0  ;;  %p1123_p9 = scmp.lt.s32.totalorder %s1401_s25, 6 }
  0x19   : > { %s1831_s14 = scalar_select %p1509_p7, 1, 0 }
  0x1a   : > { %s1515_s15 = sand.u32 1, %s1381_s20   ;;  %p1520_p10 = pnand %p1123_p9, %p58_p5 }
  0x1b   : > { %s1518_s16 = scalar_select %p47_p8, %s1381_s20, %s49_s30  }
  0x1c   : > { %s248_s18 = sand.u32 1, %s1401_s25   ;;  %s1816_s29 = sshll.u32 %s1515_s15, 5 }
  0x1d   : > { %s1817_s6 = sshll.u32 %s1500_s10, 9  ;;  %s1833_s1 = sld [smem:[#allocation25_spill]] }
  0x1e   : > { %s252_s30 = scalar_lea.vmem [#allocation14], %s1816_s29  ;;  %s1538_s12 = scalar_lea.sflag [#allocation15], %s248_s18 }
  0x1f   : > { %s264_s11 = sshll.u32 %s252_s30, 4  ;;  %p1544_p12 = pneg %p1520_p10  ;;  %s1536_s11 = int_to_ptr.vmem [resolvable:$true] %s264_s11 }
  0x23   : > { %s1532_s9 = scalar_lea.hbm %s1833_s1, %s1817_s6  ;;  %s1216_s29 = scalar_lea.hbm %s1833_s1, 1536 }
  0x24   : > { %s1211_s13 = scalar_lea.hbm %s1532_s9, 512  ;;  %p1217_p1 = scmp.lt.u32.totalorder %s1532_s9, %s1833_s1 }
  0x25   : > { %p1212_p11 = scmp.ne.s32.totalorder %s1532_s9, %s1211_s13  ;;  %p1218_p2 = scmp.lt.u32.totalorder %s1216_s29, %s1211_s13 }
  0x26   : > { %p1220_p4 = scmp.lt.u32.totalorder %s1211_s13, %s1532_s9 }
  0x27   : > { %p1214_p13 = pnand %p1544_p12, %p1212_p11  ;;  %p1219_p3 = por %p1218_p2, %p1217_p1 }
  0x29   : > { %p1215_p0 = pneg %p1214_p13  ;;  %p1221_p5 = por %p1220_p4, %p1219_p3 }
  0x2b   : > { %p1222_p6 = pnand %p1221_p5, %p1215_p0 }
  0x2d   : > { %1225 = shalt.err (!%p1222_p6)
}
  0x2e   : > { %s1226_s18 = scalar_lea.vmem %s1536_s11, 512  ;;  %s1403_s7 = smov [#allocation14]  }
  0x2f   : > { %p1227_p8 = scmp.ne.s32.totalorder %s1536_s11, %s1226_s18  ;;  %s1231_s8 = sshll.u32 %s1403_s7, 4  ;;  %s1232_s8 = int_to_ptr.vmem [resolvable:$false] %s1231_s8 }
  0x30   : > { %s1233_s6 = scalar_lea.vmem %s1232_s8, 1024  ;;  %p1234_p13 = scmp.lt.s32.totalorder %s1536_s11, %s1232_s8 }
  0x31   : > { %p1229_p9 = pnand %p1227_p8, %p1544_p12  ;;  %p1235_p7 = scmp.lt.s32.totalorder %s1233_s6, %s1226_s18 }
  0x33   : > { %p1230_p11 = pneg %p1229_p9  ;;  %p1236_p1 = por %p1235_p7, %p1234_p13 }
  0x35   : > { %p1237_p2 = pnand %p1236_p1, %p1230_p11 }
  0x37   : > { %1240 = shalt.err (!%p1237_p2)
}
  0x38   : > { %s1822_s29 = smov 128   ;;  %s1824_s13 = smov 8  }
  0x39   : > { %1119 = dma.hbm_to_vmem [thread:$0]  (!%p1520_p10), %s1532_s9, 512, %s1536_s11, %s1538_s12, %s1822_s29, %s1822_s29, %s1824_s13  }
  0x3a   : > { %s1835_s30 = sshll.u32 %s1500_s10, 9  ;;  %s1836_s6 = sshll.u32 %s1515_s15, 5 }
  0x3b   : > { %s1576_s8 = scalar_lea.hbm %s1811_s2, %s1835_s30  ;;  %s278_s1 = scalar_lea.vmem [#allocation16], %s1836_s6 }
  0x3c   : > { %s290_s27 = sshll.u32 %s278_s1, 4  ;;  %p1039_p7 = scmp.ge.s32.totalorder %s1401_s25, 1  ;;  %s1580_s27 = int_to_ptr.vmem [resolvable:$true] %s290_s27 }
  0x3d   : > { %p298_p0 = scmp.lt.s32.totalorder %s1401_s25, 7  ;;  %s1025_s23 = sshll.u32 %s1515_s15, 4 }
  0x3e   : > { %s1060_s9 = sshll.u32 %s1500_s10, 8  ;;  %s227_s1 = scalar_lea.vmem [#allocation11], %s1025_s23 }
  0x3f   : > { %p1584_p3 = pnand %p1039_p7, %p298_p0  ;;  %s1593_s18 = scalar_lea.hbm %s1809_s0, %s1060_s9 }
  0x40   : > { %s238_s30 = sshll.u32 %s227_s1, 4  ;;  %s224_s7 = scalar_lea.sflag [#allocation12], %s1515_s15  ;;  %s1595_s30 = int_to_ptr.vmem [resolvable:$true] %s238_s30 }
  0x41   : > { %s1837_s24 = scalar_select %p1584_p3, 1, 0 }
  0x42   : > { %s1241_s6 = scalar_lea.hbm %s1593_s18, 256  ;;  %s1246_s29 = scalar_lea.hbm %s1809_s0, 768 }
  0x43   : > { %p1242_p4 = scmp.ne.s32.totalorder %s1593_s18, %s1241_s6  ;;  %p1247_p8 = scmp.lt.u32.totalorder %s1593_s18, %s1809_s0 }
  0x44   : > { %p1248_p9 = scmp.lt.u32.totalorder %s1246_s29, %s1241_s6  ;;  %p1250_p13 = scmp.lt.u32.totalorder %s1241_s6, %s1593_s18 }
  0x45   : > { %p1244_p5 = pnand %p1242_p4, %p1544_p12 }
  0x46   : > { %p1249_p11 = por %p1248_p9, %p1247_p8 }
  0x47   : > { %p1245_p6 = pneg %p1244_p5 }
  0x48   : > { %p1251_p1 = por %p1250_p13, %p1249_p11 }
  0x4a   : > { %p1252_p2 = pnand %p1251_p1, %p1245_p6 }
  0x4c   : > { %1255 = shalt.err (!%p1252_p2)
}
  0x4d   : > { %s1256_s23 = scalar_lea.vmem %s1595_s30, 256  ;;  %s1406_s13 = smov [#allocation11]  }
  0x4e   : > { %p1257_p7 = scmp.ne.s32.totalorder %s1595_s30, %s1256_s23  ;;  %s1261_s1 = sshll.u32 %s1406_s13, 4  ;;  %s1262_s1 = int_to_ptr.vmem [resolvable:$false] %s1261_s1 }
  0x4f   : > { %s1263_s10 = scalar_lea.vmem %s1262_s1, 512  ;;  %p1264_p5 = scmp.lt.s32.totalorder %s1595_s30, %s1262_s1 }
  0x50   : > { %p1259_p0 = pnand %p1257_p7, %p1544_p12  ;;  %p1265_p3 = scmp.lt.s32.totalorder %s1263_s10, %s1256_s23 }
  0x52   : > { %p1260_p4 = pneg %p1259_p0  ;;  %p1266_p8 = por %p1265_p3, %p1264_p5 }
  0x54   : > { %p1267_p9 = pnand %p1266_p8, %p1260_p4 }
  0x56   : > { %1270 = shalt.err (!%p1267_p9)
}
  0x57   : > { %s1838_s6 = smov 8   ;;  %s1839_s29 = smov 128  }
  0x58   : > { %1116 = dma.hbm_to_vmem [thread:$0]  (!%p1520_p10), %s1593_s18, 256, %s1595_s30, %s224_s7, %s1839_s29, %s1839_s29, %s1838_s6  }
  0x59   : > { %s1271_s9 = scalar_lea.hbm %s1576_s8, 512  ;;  %s1276_s13 = scalar_lea.hbm %s1811_s2, 1536 }
  0x5a   : > { %p1272_p6 = scmp.ne.s32.totalorder %s1576_s8, %s1271_s9  ;;  %p1277_p13 = scmp.lt.u32.totalorder %s1576_s8, %s1811_s2 }
  0x5b   : > { %p1278_p1 = scmp.lt.u32.totalorder %s1276_s13, %s1271_s9  ;;  %p1280_p7 = scmp.lt.u32.totalorder %s1271_s9, %s1576_s8 }
  0x5c   : > { %p1274_p3 = pnand %p1272_p6, %p1544_p12 }
  0x5d   : > { %p1279_p2 = por %p1278_p1, %p1277_p13 }
  0x5e   : > { %p1275_p11 = pneg %p1274_p3 }
  0x5f   : > { %p1281_p0 = por %p1280_p7, %p1279_p2 }
  0x61   : > { %p1282_p4 = pnand %p1281_p0, %p1275_p11 }
  0x63   : > { %1285 = shalt.err (!%p1282_p4)
}
  0x64   : > { %s1286_s15 = scalar_lea.vmem %s1580_s27, 512  ;;  %s1407_s18 = smov [#allocation16]  }
  0x65   : > { %p1287_p5 = scmp.ne.s32.totalorder %s1580_s27, %s1286_s15  ;;  %s1291_s30 = sshll.u32 %s1407_s18, 4  ;;  %s1292_s30 = int_to_ptr.vmem [resolvable:$false] %s1291_s30 }
  0x66   : > { %s1293_s7 = scalar_lea.vmem %s1292_s30, 1024  ;;  %p1294_p6 = scmp.lt.s32.totalorder %s1580_s27, %s1292_s30 }
  0x67   : > { %p1289_p8 = pnand %p1287_p5, %p1544_p12  ;;  %p1295_p3 = scmp.lt.s32.totalorder %s1293_s7, %s1286_s15 }
  0x69   : > { %p1290_p9 = pneg %p1289_p8  ;;  %p1296_p13 = por %p1295_p3, %p1294_p6 }
  0x6b   : > { %p1297_p1 = pnand %p1296_p13, %p1290_p9 }
  0x6d   : > { %1300 = shalt.err (!%p1297_p1)
}
  0x6e   : > { %1122 = dma.hbm_to_vmem [thread:$0]  (!%p1520_p10), %s1576_s8, 512, %s1580_s27, %s1538_s12, %s1839_s29, %s1839_s29, %s1838_s6  }
  0x6f   : > { %p1840_p12 = scmp.ne.s32.totalorder %s1837_s24, 0 }
  0x70   : > { %s304_s28 = sand.u32 (!%p1840_p12), 1, %s1377_s19   ;;  %p1841_p11 = scmp.ne.s32.totalorder (!%p1840_p12), %s1831_s14, 0 }
  0x71   : > { %302 = sbr.rel (%p1840_p12) target bundleno = 1305 (0x519), region = 40  ;;  %s1040_s9 = sshll.u32 (!%p1840_p12), %s304_s28, 4 }
  0x72   : > { %s305_s11 = scalar_lea.sflag (!%p1840_p12), [#allocation12], %s304_s28  ;;  %s1652_s23 = scalar_lea.vmem (!%p1840_p12), [#allocation11], %s1040_s9 }
  0x78   : > { %1360 = dma.done.wait (%p1841_p11), %s305_s11, 256  }
  0x79   : > { %1362 = vsyncadd (%p1841_p11), %s305_s11, 4294967040  ;;  %s313_s17 = sand.u32 1, %s1484_s26   ;;  %s1041_s13 = sshll.u32 %s304_s28, 5 }
  0x7a   : > { %s314_s27 = scalar_lea.sflag [#allocation15], %s313_s17  ;;  %s1659_s12 = scalar_lea.vmem [#allocation14], %s1041_s13 }
  0x7b   : > { %1364 = dma.done.wait (%p1841_p11), %s314_s27, 1024  }
  0x7c   : > { %1366 = vsyncadd (%p1841_p11), %s314_s27, 4294966272  ;;  %p373_p10 = scmp.eq.s32.totalorder %s1389_s22, 0  ;;  %p374_p2 = scmp.eq.s32.totalorder %s1385_s21, 0 }
  0x7d   : > { %s1667_s24 = scalar_lea.vmem [#allocation16], %s1041_s13 }
  0x7e   : > { %p375_p7 = pnand %p374_p2, %p373_p10 }
  0x7f   : > { %v379_v0 = vld [vmem:[%s1812_s3] sm:$0xff] (!%p375_p7)  ;;  %vm381_vm0 = vcmask (!%p375_p7), 64512   ;;  %v380_v1 = vld [vmem:[%s1812_s3 + $0x8] sm:$0xff] (!%p375_p7)  ;;  %vm386_vm1 = vcmask (!%p375_p7), 122880   ;;  %v1408_v2 = vmov (!%p375_p7), inf   ;;  %v1409_v3 = vmov (!%p375_p7), -inf  }
  0x80   : > { %378 = sbr.rel (%p375_p7) target bundleno = 135 (0x87), region = 56  ;;  %382 = vst.msk [vmem:[#allocation10] sm:$0xff] (!%p375_p7), %vm381_vm0, %v379_v0  ;;  %384 = vst.msk [vmem:[#allocation10 + $0x10] sm:$0xff] (!%p375_p7), %vm381_vm0, %v379_v0 }
  0x81   : > { %383 = vst.msk [vmem:[#allocation10 + $0x8] sm:$0xff] (!%p375_p7), %vm381_vm0, %v380_v1  ;;  %385 = vst.msk [vmem:[#allocation10 + $0x18] sm:$0xff] (!%p375_p7), %vm381_vm0, %v380_v1 }
  0x82   : > { %387 = vst.msk [vmem:[#allocation2] sm:$0x1] (!%p375_p7), %vm386_vm1, %v1408_v2  ;;  %388 = vst.msk [vmem:[#allocation4] sm:$0x1] (!%p375_p7), %vm386_vm1, %v1408_v2 }
  0x83   : > { %389 = vst.msk [vmem:[#allocation3] sm:$0x1] (!%p375_p7), %vm386_vm1, %v1409_v3  ;;  %390 = vst.msk [vmem:[#allocation5] sm:$0x1] (!%p375_p7), %vm386_vm1, %v1409_v3 }
  0x87 PF: > { %v393_v4 = vld [vmem:[%s1813_s4] sm:$0xff]  ;;  %v391_v5 = vld [vmem:[%s1652_s23] sm:$0xff]  ;;  %vm394_vm2 = vcmask 64512   ;;  %v643_v14 = vld [vmem:[%s1659_s12 + $0x8] sm:$0xff]  ;;  %p1049_p0 = scmp.ne.s32.totalorder %s1389_s22, 0 }
  0x88   : > { %v392_v6 = vld [vmem:[%s1652_s23 + $0x8] sm:$0xff]  ;;  %1074 = vmatprep.subr.mxu0 %v393_v4  ;;  %1076 = vmatprep.mubr.msk.f32.mxu0 %vm394_vm2, %v391_v5  ;;  %v478_v7 = vld [vmem:[#allocation10 + $0x10] sm:$0xff]  ;;  %v476_v8 = vld [vmem:[#allocation10] sm:$0xff]  ;;  %vm670_vm3 = vcmask (!%p1049_p0), 130048   ;;  %vm685_vm4 = vcmask (!%p1049_p0), 122880  }
  0x89   : > { %1075 = vmatpush3.msra.mxu0 %v393_v4  ;;  %1081 = vmatprep.mubr.msk.f32.mxu1 %vm394_vm2, %v476_v8  ;;  %v479_v10 = vld [vmem:[#allocation10 + $0x18] sm:$0xff]  ;;  %v477_v12 = vld [vmem:[#allocation10 + $0x8] sm:$0xff]  ;;  %v644_v15 = vld [vmem:[%s1659_s12 + $0x10] sm:$0xff] }
  0x8a   : > { %1077 = vmatmul.mubr.msk.f32.vlgmr.msra.gmra.mrb[0].mxu0 %vm394_vm2, %v392_v6  ;;  %v645_v13 = vld [vmem:[%s1659_s12 + $0x18] sm:$0xff]  ;;  %v642_v18 = vld [vmem:[%s1659_s12] sm:$0xff]  ;;  %v655_v20 = vld [vmem:[%s1667_s24 + $0x8] sm:$0xff] }
  0x8b   : > { %1086 = vmatprep.mubr.msk.f32.mxu0 %vm394_vm2, %v478_v7  ;;  %v657_v17 = vld [vmem:[%s1667_s24 + $0x18] sm:$0xff]  ;;  %v656_v23 = vld [vmem:[%s1667_s24 + $0x10] sm:$0xff]  ;;  %v654_v26 = vld [vmem:[%s1667_s24] sm:$0xff] }
 0x15d   : > { %v1078_v9 = vpop.f32.mrb[0].mxu0 }
 0x15e   : > { %v467_v11 = vpop.f32.mrb[1].mxu0  ;;  %1084 = vmatprep.subr.mxu0 %v1078_v9 }
 0x15f   : > { %1079 = vmatprep.subr.mxu1 %v467_v11  ;;  %1085 = vmatpush3.msra.mxu0 %v1078_v9 }
 0x160   : > { %1080 = vmatpush3.msra.mxu1 %v467_v11  ;;  %1087 = vmatmul.mubr.msk.f32.vlgmr.msra.gmra.mrb[2].mxu0 %vm394_vm2, %v479_v10 }
 0x161   : > { %1082 = vmatmul.mubr.msk.f32.vlgmr.msra.gmra.mrb[0].mxu1 %vm394_vm2, %v477_v12 }
 0x233   : > { %v1088_v16 = vpop.f32.mrb[2].mxu0 }
 0x234   : > { %v1083_v19 = vpop.f32.mrb[0].mxu1  ;;  %v649_v21 = vsub.f32 %v645_v13, %v1088_v16  ;;  %v633_v22 = vpop.f32.mrb[3].mxu0  ;;  %668 = sbr.rel (%p1049_p0) target bundleno = 595 (0x253), region = 60 }
 0x235   : > { %v647_v24 = vsub.f32 %v643_v14, %v1083_v19  ;;  %v552_v25 = vpop.f32.mrb[1].mxu1  ;;  %v648_v27 = vsub.f32 %v644_v15, %v633_v22  ;;  %v669_v19 = vld [vmem:[#allocation2] sm:$0x1] (!%p1049_p0) }
 0x236   : > { %v1694_v28 = vand.u32 2147483647, %v649_v21  ;;  %v661_v29 = vsub.f32 %v649_v21, %v657_v17  ;;  %v646_v30 = vsub.f32 %v642_v18, %v552_v25 }
 0x237   : > { %v1696_v31 = vand.u32 2147483647, %v647_v24  ;;  %v659_v32 = vsub.f32 %v647_v24, %v655_v20  ;;  %v1698_v33 = vand.u32 2147483647, %v648_v27  ;;  %v660_v34 = vsub.f32 %v648_v27, %v656_v23  ;;  %v687_v24 = vld [vmem:[#allocation3] sm:$0x1] (!%p1049_p0) }
 0x238   : > { %v1700_v35 = vand.u32 2147483647, %v661_v29  ;;  %v1702_v36 = vand.u32 2147483647, %v646_v30  ;;  %v658_v37 = vsub.f32 %v646_v30, %v654_v26  ;;  %v674_v44 = vsel (!%p1049_p0), %vm670_vm3, %v1694_v28, inf }
 0x239   : > { %v1704_v38 = vand.u32 2147483647, %v659_v32  ;;  %v1706_v39 = vand.u32 2147483647, %v660_v34  ;;  %v672_v42 = vsel (!%p1049_p0), %vm670_vm3, %v1696_v31, inf  ;;  %v673_v43 = vsel (!%p1049_p0), %vm670_vm3, %v1698_v33, inf }
 0x23a   : > { %v1708_v40 = vand.u32 2147483647, %v658_v37  ;;  %v671_v41 = vsel (!%p1049_p0), %vm670_vm3, %v1702_v36, inf  ;;  %v676_v46 = vmin.f32 (!%p1049_p0), %v673_v43, %v674_v44  ;;  %v688_v47 = vsel (!%p1049_p0), %vm670_vm3, %v1702_v36, -inf  ;;  %v703_v30 = vld [vmem:[#allocation4] sm:$0x1] (!%p1049_p0) }
 0x23b   : > { %v675_v45 = vmin.f32 %v671_v41, %v672_v42  ;;  %v689_v48 = vsel %vm670_vm3, %v1696_v31, -inf  ;;  %v690_v49 = vsel %vm670_vm3, %v1698_v33, -inf  ;;  %v691_v50 = vsel %vm670_vm3, %v1694_v28, -inf  ;;  %v719_v41 = vld [vmem:[#allocation5] sm:$0x1] }
 0x23c   : > { %v692_v51 = vmax.f32 %v688_v47, %v689_v48  ;;  %v704_v52 = vsel %vm670_vm3, %v1708_v40, inf  ;;  %v693_v54 = vmax.f32 %v690_v49, %v691_v50  ;;  %v705_v55 = vsel %vm670_vm3, %v1704_v38, inf }
 0x23d   : > { %v677_v53 = vmin.f32 %v675_v45, %v676_v46  ;;  %v706_v56 = vsel %vm670_vm3, %v1706_v39, inf  ;;  %v707_v57 = vsel %vm670_vm3, %v1700_v35, inf  ;;  %v708_v58 = vmin.f32 %v704_v52, %v705_v55 }
 0x23e   : > { %v720_v59 = vsel %vm670_vm3, %v1708_v40, -inf  ;;  %v721_v60 = vsel %vm670_vm3, %v1704_v38, -inf  ;;  %v694_v62 = vmax.f32 %v692_v51, %v693_v54  ;;  %v709_v63 = vmin.f32 %v706_v56, %v707_v57 }
 0x23f   : > { %v678_v61 = vrot.slane %v677_v53, 4  ;;  %v722_v0 = vsel %vm670_vm3, %v1706_v39, -inf  ;;  %v723_v1 = vsel %vm670_vm3, %v1700_v35, -inf  ;;  %v724_v2 = vmax.f32 %v720_v59, %v721_v60 }
 0x240   : > { %v695_v4 = vrot.slane %v694_v62, 4  ;;  %v710_v5 = vmin.f32 %v708_v58, %v709_v63  ;;  %v725_v6 = vmax.f32 %v722_v0, %v723_v1 }
 0x241   : > { %v679_v3 = vmin.f32 %v677_v53, %v678_v61 }
 0x242   : > { %v696_v8 = vmax.f32 %v694_v62, %v695_v4  ;;  %v711_v9 = vrot.slane %v710_v5, 4  ;;  %v726_v10 = vmax.f32 %v724_v2, %v725_v6 }
 0x243   : > { %v680_v7 = vrot.slane %v679_v3, 2 }
 0x244   : > { %v697_v12 = vrot.slane %v696_v8, 2  ;;  %v712_v13 = vmin.f32 %v710_v5, %v711_v9  ;;  %v727_v14 = vrot.slane %v726_v10, 4 }
 0x245   : > { %v681_v11 = vmin.f32 %v679_v3, %v680_v7 }
 0x246   : > { %v698_v16 = vmax.f32 %v696_v8, %v697_v12  ;;  %v713_v17 = vrot.slane %v712_v13, 2  ;;  %v728_v18 = vmax.f32 %v726_v10, %v727_v14 }
 0x247   : > { %v682_v15 = vrot.slane %v681_v11, 1 }
 0x248   : > { %v699_v21 = vrot.slane %v698_v16, 1  ;;  %v714_v22 = vmin.f32 %v712_v13, %v713_v17  ;;  %v729_v23 = vrot.slane %v728_v18, 2 }
 0x249   : > { %v683_v20 = vmin.f32 %v681_v11, %v682_v15 }
 0x24a   : > { %v700_v26 = vmax.f32 %v698_v16, %v699_v21  ;;  %v715_v27 = vrot.slane %v714_v22, 1  ;;  %v730_v29 = vmax.f32 %v728_v18, %v729_v23 }
 0x24b   : > { %v684_v25 = vmin.f32 %v669_v19, %v683_v20 }
 0x24c   : > { %v701_v32 = vmax.f32 %v687_v24, %v700_v26  ;;  %v716_v34 = vmin.f32 %v714_v22, %v715_v27  ;;  %v731_v37 = vrot.slane %v730_v29, 1 }
 0x24d   : > { %686 = vst.msk [vmem:[#allocation2] sm:$0x1] %vm685_vm4, %v684_v25 }
 0x24e   : > { %702 = vst.msk [vmem:[#allocation3] sm:$0x1] %vm685_vm4, %v701_v32  ;;  %v717_v42 = vmin.f32 %v703_v30, %v716_v34  ;;  %v732_v43 = vmax.f32 %v730_v29, %v731_v37 }
 0x250   : > { %718 = vst.msk [vmem:[#allocation4] sm:$0x1] %vm685_vm4, %v717_v42  ;;  %v733_v44 = vmax.f32 %v719_v41, %v732_v43 }
 0x252   : > { %734 = vst.msk [vmem:[#allocation5] sm:$0x1] %vm685_vm4, %v733_v44 }
 0x253 PF: > { %p1050_p4 = scmp.ne.s32.totalorder %s1389_s22, 1 }
 0x254   : > { %p1051_p5 = scmp.ne.s32.totalorder (!%p1050_p4), %s1385_s21, 0 }
 0x255   : > { %738 = sbr.rel (%p1050_p4) target bundleno = 1280 (0x500), region = 64 }
 0x25c   : > { %741 = sbr.rel (%p1051_p5) target bundleno = 886 (0x376), region = 68  ;;  %vm743_vm5 = vcmask (!%p1051_p5), 122880   ;;  %v765_v45 = vld [vmem:[#allocation4] sm:$0x1] (!%p1051_p5)  ;;  %v742_v46 = vld [vmem:[#allocation2] sm:$0x1] (!%p1051_p5) }
 0x25d   : > { %v766_v47 = vsel (!%p1051_p5), %vm743_vm5, %v765_v45, inf  ;;  %v1410_v48 = vmov (!%p1051_p5), 0.0   ;;  %v744_v49 = vsel (!%p1051_p5), %vm743_vm5, %v742_v46, inf  ;;  %v776_v50 = vld [vmem:[#allocation5] sm:$0x1] (!%p1051_p5)  ;;  %vm796_vm6 = vcmask (!%p1051_p5), 0  }
 0x25e   : > { %805 = vst.msk [vmem:[#allocation6] sm:$0x1] (!%p1051_p5), %vm743_vm5, %v1410_v48  ;;  %v754_v51 = vld [vmem:[#allocation3] sm:$0x1] (!%p1051_p5)  ;;  %767 = vmin.xlane.f32.xlu1 (!%p1051_p5), %v766_v47  ;;  %745 = vmin.xlane.f32.xlu0 (!%p1051_p5), %v744_v49  ;;  %v777_v52 = vsel (!%p1051_p5), %vm743_vm5, %v776_v50, -inf }
 0x25f   : > { %v755_v53 = vsel (!%p1051_p5), %vm743_vm5, %v754_v51, -inf }
 0x262   : > { %778 = vmax.xlane.f32.xlu1 (!%p1051_p5), %v777_v52  ;;  %756 = vmax.xlane.f32.xlu0 (!%p1051_p5), %v755_v53 }
 0x2eb   : > { %v768_v54 = vpop.xlane.xlu1 %767  ;;  %v746_v55 = vpop.xlane.xlu0 %745 }
 0x2ec   : > { %v769_v56 = vrot.slane %v768_v54, 4  ;;  %v747_v57 = vrot.slane %v746_v55, 4 }
 0x2ee   : > { %v770_v58 = vmin.f32 %v768_v54, %v769_v56  ;;  %v748_v59 = vmin.f32 %v746_v55, %v747_v57 }
 0x2ef   : > { %v779_v60 = vpop.xlane.xlu1 %778  ;;  %v757_v61 = vpop.xlane.xlu0 %756 }
 0x2f0   : > { %v771_v62 = vrot.slane %v770_v58, 2  ;;  %v749_v63 = vrot.slane %v748_v59, 2  ;;  %v780_v0 = vrot.slane %v779_v60, 4  ;;  %v758_v1 = vrot.slane %v757_v61, 4 }
 0x2f2   : > { %v781_v2 = vmax.f32 %v779_v60, %v780_v0  ;;  %v759_v3 = vmax.f32 %v757_v61, %v758_v1  ;;  %v750_v4 = vmin.f32 %v748_v59, %v749_v63  ;;  %v772_v5 = vmin.f32 %v770_v58, %v771_v62 }
 0x2f4   : > { %v782_v6 = vrot.slane %v781_v2, 2  ;;  %v760_v7 = vrot.slane %v759_v3, 2  ;;  %v751_v8 = vrot.slane %v750_v4, 1  ;;  %v773_v12 = vrot.slane %v772_v5, 1 }
 0x2f6   : > { %v783_v9 = vmax.f32 %v781_v2, %v782_v6  ;;  %v761_v10 = vmax.f32 %v759_v3, %v760_v7  ;;  %v752_v11 = vmin.f32 %v750_v4, %v751_v8  ;;  %v774_v17 = vmin.f32 %v772_v5, %v773_v12 }
 0x2f8   : > { %1089 = vpush %v752_v11  ;;  %v762_v13 = vrot.slane %v761_v10, 1  ;;  %v784_v14 = vrot.slane %v783_v9, 1 }
 0x2fa   : > { %v763_v15 = vmax.f32 %v761_v10, %v762_v13  ;;  %v785_v16 = vmax.f32 %v783_v9, %v784_v14 }
 0x2fc   : > { %1091 = vpush %v763_v15 }
 0x2fd   : > { %1093 = vpush %v774_v17 }
 0x2fe   : > { %1095 = vpush %v785_v16 }
 0x329   : > { %s1090_s22 = spop %1089 }
 0x32d   : > { %s1092_s15 = spop %1091 }
 0x32e   : > { %s787_s18 = ssub.f32 %s1092_s15, %s1090_s22  ;;  %s1094_s30 = spop %1093 }
 0x32f   : > { %s1096_s7 = spop %1095 }
 0x330   : > { %v788_v18 = vstv %s787_s18  ;;  %s791_s28 = ssub.f32 %s1096_s7, %s1094_s30 }
 0x331   : > { %1197 = vrcp.f32 %v788_v18 }
 0x332   : > { %v792_v19 = vstv %s791_s28 }
 0x333   : > { %1199 = vrcp.f32 %v792_v19 }
 0x33b   : > { %v1198_v20 = vpop.eup %1197 }
 0x33c   : > { %1097 = vpush %v1198_v20 }
 0x33d   : > { %v1200_v21 = vpop.eup %1199 }
 0x33e   : > { %1099 = vpush %v1200_v21 }
 0x36d   : > { %s1098_s9 = spop %1097 }
 0x36e   : > { %v795_v22 = vstv %s1098_s9  ;;  %s800_s11 = smul.f32 %s1098_s9, %s1090_s22 }
 0x36f   : > { %797 = vst.msk [vmem:[#allocation7] sm:$0x1] %vm796_vm6, %v795_v22  ;;  %s1100_s23 = spop %1099 }
 0x370   : > { %v798_v23 = vstv %s1100_s23  ;;  %s801_s17 = smul.f32 %s1100_s23, %s1094_s30 }
 0x371   : > { %799 = vst.msk [vmem:[#allocation8] sm:$0x1] %vm796_vm6, %v798_v23 }
 0x372   : > { %s802_s13 = sadd.f32 %s801_s17, %s800_s11 }
 0x374   : > { %v803_v24 = vstv %s802_s13 }
 0x375   : > { %804 = vst.msk [vmem:[#allocation9] sm:$0x1] %vm796_vm6, %v803_v24 }
 0x376 PF: > { %v1052_v25 = vld [vmem:[#allocation7] ss:$0 sm:$0xff]  ;;  %v1411_v26 = vmov 0   ;;  %vm865_vm7 = vcmask 130048   ;;  %vm880_vm8 = vcmask 122880   ;;  %p1055_p8 = scmp.ne.s32.totalorder %s1385_s21, 2 }
 0x377   : > { %1201 = vset.pattern.permute.xlu0 %v1411_v26  ;;  %1202 = vset.pattern.permute.xlu1 %v1411_v26  ;;  %vm899_vm9 = vcmask (!%p1055_p8), 0  }
 0x378   : > { %815 = vperm.xlu0 %1201, %v1052_v25   ;;  %v1053_v29 = vld [vmem:[#allocation8] ss:$0 sm:$0xff]  ;;  %v860_v11 = vld [vmem:[#allocation6] sm:$0x1] }
 0x37c   : > { %v1054_v27 = vld [vmem:[#allocation9] ss:$0 sm:$0xff]  ;;  %828 = vperm.xlu0 %1201, %v1053_v29  }
 0x37d   : > { %845 = vperm.xlu1 %1202, %v1054_v27  }
 0x3f7   : > { %v816_v30 = vpop.permute.xlu0 %815 }
 0x3f8   : > { %v818_v32 = vmul.f32 %v816_v30, %v1702_v36  ;;  %v819_v34 = vmul.f32 %v816_v30, %v1696_v31  ;;  %v820_v37 = vmul.f32 %v816_v30, %v1698_v33  ;;  %v821_v41 = vmul.f32 %v816_v30, %v1694_v28 }
 0x3fb   : > { %v829_v42 = vpop.permute.xlu0 %828 }
 0x3fc   : > { %v831_v43 = vmul.f32 %v829_v42, %v1708_v40  ;;  %v832_v44 = vmul.f32 %v829_v42, %v1704_v38  ;;  %v833_v45 = vmul.f32 %v829_v42, %v1706_v39  ;;  %v834_v46 = vmul.f32 %v829_v42, %v1700_v35  ;;  %v846_v47 = vpop.permute.xlu1 %845 }
 0x3fe   : > { %v835_v48 = vadd.f32 %v831_v43, %v818_v32  ;;  %v836_v49 = vadd.f32 %v832_v44, %v819_v34  ;;  %v837_v50 = vadd.f32 %v833_v45, %v820_v37  ;;  %v838_v36 = vadd.f32 %v834_v46, %v821_v41 }
 0x400   : > { %v848_v51 = vsub.f32 %v835_v48, %v846_v47  ;;  %v849_v31 = vsub.f32 %v836_v49, %v846_v47  ;;  %v850_v52 = vsub.f32 %v837_v50, %v846_v47  ;;  %v851_v33 = vsub.f32 %v838_v36, %v846_v47 }
 0x402   : > { %v852_v53 = vmul.f32 1.442695, %v848_v51  ;;  %v854_v28 = vmul.f32 1.442695, %v849_v31  ;;  %v856_v54 = vmul.f32 1.442695, %v850_v52 }
 0x403   : > { %v858_v55 = vmul.f32 1.442695, %v851_v33 }
 0x404   : > { %1203 = vpow2.f32 %v852_v53 }
 0x405   : > { %1205 = vpow2.f32 %v854_v28 }
 0x406   : > { %1207 = vpow2.f32 %v856_v54 }
 0x407   : > { %1209 = vpow2.f32 %v858_v55 }
 0x40e   : > { %v1204_v56 = vpop.eup %1203 }
 0x40f   : > { %v1206_v57 = vpop.eup %1205  ;;  %v861_v58 = vmul.f32 %v1204_v56, %v1708_v40 }
 0x410   : > { %v1208_v59 = vpop.eup %1207  ;;  %v862_v60 = vmul.f32 %v1206_v57, %v1704_v38 }
 0x411   : > { %v1210_v61 = vpop.eup %1209  ;;  %v863_v62 = vmul.f32 %v1208_v59, %v1706_v39  ;;  %v866_v63 = vsel %vm865_vm7, %v861_v58, 0.0 }
 0x412   : > { %v864_v0 = vmul.f32 %v1210_v61, %v1700_v35  ;;  %v867_v1 = vsel %vm865_vm7, %v862_v60, 0.0 }
 0x413   : > { %v868_v2 = vadd.f32 %v867_v1, %v866_v63  ;;  %v869_v3 = vsel %vm865_vm7, %v863_v62, 0.0 }
 0x414   : > { %v871_v5 = vsel %vm865_vm7, %v864_v0, 0.0 }
 0x415   : > { %v870_v4 = vadd.f32 %v869_v3, %v868_v2 }
 0x417   : > { %v872_v6 = vadd.f32 %v871_v5, %v870_v4 }
 0x419   : > { %v873_v7 = vrot.slane %v872_v6, 4 }
 0x41b   : > { %v874_v8 = vadd.f32 %v873_v7, %v872_v6 }
 0x41d   : > { %v875_v9 = vrot.slane %v874_v8, 2 }
 0x41f   : > { %v876_v10 = vadd.f32 %v875_v9, %v874_v8 }
 0x421   : > { %v877_v40 = vrot.slane %v876_v10, 1  ;;  %885 = sbr.rel (%p1055_p8) target bundleno = 1280 (0x500), region = 72 }
 0x423   : > { %v878_v12 = vadd.f32 %v877_v40, %v876_v10 }
 0x425   : > { %v879_v38 = vadd.f32 %v878_v12, %v860_v11 }
 0x427   : > { %881 = vst.msk [vmem:[#allocation6] sm:$0x1] %vm880_vm8, %v879_v38 }
 0x42e   : > { %v886_v35 = vld [vmem:[#allocation6] sm:$0x1] }
 0x42f   : > { %v887_v39 = vsel %vm880_vm8, %v886_v35, 0.0 }
 0x430   : > { %888 = vadd.xlane.f32.xlu0 %v887_v39 }
 0x4bd   : > { %v889_v13 = vpop.xlane.xlu0 %888 }
 0x4be   : > { %v890_v14 = vrot.slane %v889_v13, 4 }
 0x4c0   : > { %v891_v15 = vadd.f32 %v890_v14, %v889_v13 }
 0x4c2   : > { %v892_v16 = vrot.slane %v891_v15, 2 }
 0x4c4   : > { %v893_v17 = vadd.f32 %v892_v16, %v891_v15 }
 0x4c6   : > { %v894_v18 = vrot.slane %v893_v17, 1 }
 0x4c8   : > { %v895_v19 = vadd.f32 %v894_v18, %v893_v17 }
 0x4ca   : > { %1101 = vpush %v895_v19 }
 0x4fb   : > { %s1102_s27 = spop %1101 }
 0x4fc   : > { %v897_v20 = vstv %s1102_s27 }
 0x4fd   : > { %v898_v21 = vmul.f32 0.00032552084, %v897_v20 }
 0x4ff   : > { %900 = vst.msk [vmem:[#allocation17] sm:$0x1] %vm899_vm9, %v898_v21 }
 0x500 PF: > { %p1124_p9 = scmp.eq.s32.totalorder %s1484_s26, 5  ;;  %s1412_s21 = smov [#allocation17]  }
 0x501   : > { %s908_s12 = sshll.u32 %s1412_s21, 4  ;;  %s909_s12 = int_to_ptr.vmem [resolvable:$true] %s908_s12 }
 0x502   : > { %s1301_s24 = scalar_lea.vmem %s909_s12, 16  ;;  %s1307_s8 = scalar_lea.vmem %s909_s12, 32 }
 0x503   : > { %p1302_p6 = scmp.ne.s32.totalorder %s909_s12, %s1301_s24  ;;  %p1308_p1 = scmp.lt.s32.totalorder %s909_s12, %s909_s12 }
 0x504   : > { %p1309_p12 = scmp.lt.s32.totalorder %s1307_s8, %s1301_s24 }
 0x505   : > { %p1303_p3 = pnand %p1302_p6, %p1124_p9 }
 0x506   : > { %p1310_p11 = por %p1309_p12, %p1308_p1 }
 0x507   : > { %p1304_p13 = pneg %p1303_p3 }
 0x509   : > { %p1311_p10 = pnand %p1310_p11, %p1304_p13 }
 0x50b   : > { %1314 = shalt.err (!%p1311_p10)
}
 0x50c   : > { %s1315_s1 = scalar_lea.hbm %s1814_s5, 16 }
 0x50d   : > { %p1316_p2 = scmp.ne.s32.totalorder %s1814_s5, %s1315_s1  ;;  %p1321_p4 = scmp.lt.u32.totalorder %s1315_s1, %s1814_s5 }
 0x50f   : > { %p1317_p7 = pnand %p1316_p2, %p1124_p9 }
 0x511   : > { %p1318_p0 = pneg %p1317_p7 }
 0x513   : > { %p1323_p5 = pnand %p1321_p4, %p1318_p0 }
 0x515   : > { %1326 = shalt.err (!%p1323_p5)
}
 0x516   : > { %1110 = dma.vmem_to_hbm [thread:$0]  (%p1124_p9), %s909_s12, 16, %s1814_s5, [#allocation13]  }
 0x517   : > { %1368 = dma.done.wait (%p1124_p9), [#allocation13], 16  }
 0x518   : > { %1370 = vsyncadd (%p1124_p9), [#allocation13], 4294967280 }
 0x519 PF: > { %s22_s25 = sadd.s32 1, %s1401_s25   ;;  %s1842_s21 = sld [smem:[#allocation21_spill]] }
 0x51a   : > { %p19_p8 = scmp.ge.s32.totalorder %s22_s25, 8   ;;  %s1843_s22 = sld [smem:[#allocation22_spill]] }
 0x51b   : > { %s1844_s23 = sld [smem:[#allocation23_spill]]  ;;  %s1845_s24 = sld [smem:[#allocation24_spill]] }
 0x51c   : > { %s1846_s18 = smov %s1377_s19  ;;  %s1847_s19 = smov %s1381_s20 }
 0x51d   : > { %s1848_s20 = smov %s1518_s16  ;;  %21 = sbr.rel (!%p19_p8) target bundleno = 10 (0xa), region = 121 }
 0x524   :  { %921 = vsyncpa [#allocation12], 1 }
 0x525   :  { %923 = vsyncpa [#allocation12 + $0x1], 1 }
 0x526   :  { %924 = vsyncpa [#allocation15], 1 }
 0x527   :  { %926 = vsyncpa [#allocation15 + $0x1], 1 }
 0x528   :  { %927 = vsyncpa [#allocation13], 1 }
 0x529   :  { %929 = vsyncpa [#allocation13 + $0x1], 1 }

</bundles_post_ra>
